<compile_context>
chip_gen: v5e
topology: v5e:2x2
jax: 0.10.0
libtpu: 0.0.40
codegen_flags: <defaults>
</compile_context>

<pallas_src>
import functools

import numpy as np
import jax
import jax.numpy as jnp
from jax.experimental import pallas as pl
from jax.experimental.pallas import tpu as pltpu


# -----------------------------------------------------------------------------
# Deterministic parameter construction (librosa-style chroma filterbank,
# re-implemented in numpy; synthetic, no checkpoint loading).
# -----------------------------------------------------------------------------
def _round_up(x, m):
    return (x + m - 1) // m * m


def chroma_filterbank(sr, n_fft, n_chroma=12):
    A440 = 440.0
    frequencies = np.linspace(0, sr, n_fft, endpoint=False)[1:]
    frqbins = n_chroma * np.log2(frequencies / (A440 / 16.0))
    frqbins = np.concatenate(([frqbins[0] - 1.5 * n_chroma], frqbins))
    binwidthbins = np.concatenate(
        (np.maximum(frqbins[1:] - frqbins[:-1], 1.0), [1.0]))
    D = np.subtract.outer(frqbins, np.arange(0, n_chroma, dtype="d")).T
    n_chroma2 = np.round(float(n_chroma) / 2)
    D = np.remainder(D + n_chroma2 + 10 * n_chroma, n_chroma) - n_chroma2
    wts = np.exp(-0.5 * (2 * D / np.tile(binwidthbins, (n_chroma, 1))) ** 2)
    # column-wise L2 normalization
    wts = wts / np.maximum(np.sqrt(np.sum(wts ** 2, axis=0, keepdims=True)), 1e-10)
    # Gaussian octave-centering weight (ctroct=5.0, octwidth=2)
    wts *= np.tile(
        np.exp(-0.5 * (((frqbins / n_chroma - 5.0) / 2.0) ** 2)), (n_chroma, 1))
    # base_c roll
    wts = np.roll(wts, -3 * (n_chroma // 12), axis=0)
    return np.ascontiguousarray(
        wts[:, : int(1 + n_fft // 2)], dtype=np.float32)  # [12, F]


def fused_dft_basis(n_fft, f_pad):
    """Rectangular-window one-sided DFT basis, [cos | -sin], zero-padded lanes.

    Returns [n_fft, 2*f_pad] f32 with cos in columns [0, F) and -sin in
    columns [f_pad, f_pad+F); padded columns are zero (harmless: mag = 0).
    """
    F = n_fft // 2 + 1
    n = np.arange(n_fft, dtype=np.float64)[:, None]
    f = np.arange(F, dtype=np.float64)[None, :]
    ang = 2.0 * np.pi * n * f / float(n_fft)
    basis = np.zeros((n_fft, 2 * f_pad), dtype=np.float32)
    basis[:, :F] = np.cos(ang)
    basis[:, f_pad:f_pad + F] = -np.sin(ang)
    return basis


# -----------------------------------------------------------------------------
# Pallas kernel
# -----------------------------------------------------------------------------
def _chroma_kernel(hop, R, f_pad, t_tile,
                   chunks_ref,    # [C, hop]          f32  (whole padded row)
                   basis_ref,     # [n_fft, 2*f_pad]  bf16 (constant)
                   chw_ref,       # [f_pad, 128]      bf16 (constant)
                   out_ref,       # [t_tile, 128]     f32
                   frames_ref):   # [t_tile, n_fft]   f32 VMEM scratch
    ti = pl.program_id(1)
    t0 = ti * t_tile

    # Build this tile's frame matrix in VMEM: frame t = hop-chunks
    # [t, t+1, ..., t+R-1] laid side by side (R * hop == n_fft).
    for r in range(R):
        frames_ref[:, r * hop:(r + 1) * hop] = chunks_ref[pl.ds(t0 + r, t_tile), :]

    frames = frames_ref[...].astype(jnp.bfloat16)

    # One fused MXU matmul gives real | imag halves of the one-sided DFT.
    ri = jnp.dot(frames, basis_ref[...], preferred_element_type=jnp.float32)
    real = ri[:, :f_pad]
    imag = ri[:, f_pad:]
    mag = jnp.sqrt(real * real + imag * imag)       # EUP slot; hides under MXU

    # Chroma projection; output block is lane-dense (128 wide, cols >= 12 are 0).
    out_ref[...] = jnp.dot(mag.astype(jnp.bfloat16), chw_ref[...],
                           preferred_element_type=jnp.float32)


def get_chroma(x, wav_lengths, *, sr, hop_length, n_fft, t_tile=256):
    """Equivalent of GetChroma.forward.  x: [B, L] float32, wav_lengths: [B] int."""
    B, L = x.shape
    F = n_fft // 2 + 1
    f_pad = _round_up(F, 128)
    T = L // hop_length + 1                 # torch.stft(center=True) frame count

    if n_fft % hop_length != 0:
        # TODO(synk): general hop (n_fft % hop != 0) needs strided in-kernel framing.
        raise NotImplementedError("kernel requires n_fft % hop_length == 0")
    R = n_fft // hop_length                 # hop-chunks per frame

    # T tiling (keeps VMEM bounded on v5e/v7x and gives megacore work at small B).
    t_tile = min(t_tile, T)
    nT = -(-T // t_tile)
    T_pad = nT * t_tile

    # --- glue: reflect pad (torch.stft center=True, rectangular window) and
    #     reshape into non-overlapping hop-sized chunks (no n_fft/hop blow-up).
    pad = n_fft // 2
    x_pad = jnp.pad(x, ((0, 0), (pad, pad)), mode="reflect")
    C = T_pad + R - 1
    need = C * hop_length
    have = L + 2 * pad
    if need > have:
        x_pad = jnp.pad(x_pad, ((0, 0), (0, need - have)))
    elif need < have:
        x_pad = x_pad[:, :need]
    chunks = x_pad.reshape(B, C, hop_length).astype(jnp.float32)

    # --- constant operands (bf16, f32 accumulation in-kernel) ---
    basis = jnp.asarray(fused_dft_basis(n_fft, f_pad), dtype=jnp.bfloat16)
    chw_np = np.zeros((f_pad, 128), dtype=np.float32)
    chw_np[:F, :12] = chroma_filterbank(sr, n_fft).T
    chw = jnp.asarray(chw_np, dtype=jnp.bfloat16)

    grid_spec = pltpu.PrefetchScalarGridSpec(
        num_scalar_prefetch=0,
        grid=(B, nT),
        in_specs=[
            pl.BlockSpec((None, C, hop_length), lambda b, t: (b, 0, 0)),
            pl.BlockSpec((n_fft, 2 * f_pad), lambda b, t: (0, 0)),
            pl.BlockSpec((f_pad, 128), lambda b, t: (0, 0)),
        ],
        out_specs=pl.BlockSpec((None, t_tile, 128), lambda b, t: (b, t, 0)),
        scratch_shapes=[pltpu.VMEM((t_tile, n_fft), jnp.float32)],
    )

    out = pl.pallas_call(
        functools.partial(_chroma_kernel, hop_length, R, f_pad, t_tile),
        out_shape=jax.ShapeDtypeStruct((B, T_pad, 128), jnp.float32),
        grid_spec=grid_spec,
        compiler_params=pltpu.CompilerParams(
            dimension_semantics=("parallel", "parallel"),
            vmem_limit_bytes=48 * 1024 * 1024),
    )(chunks, basis, chw)

    chroma = jnp.transpose(out[:, :T, :12], (0, 2, 1))       # [B, 12, T]

    # chroma_lengths = -(-wav_lengths // hop)  (== ceil(len/hop), exactly torch)
    wl = wav_lengths.astype(jnp.int32)
    clen = -((-wl) // hop_length)
    chroma_mask = (jnp.arange(T, dtype=jnp.int32)[None, :]
                   < clen[:, None]).astype(jnp.int32)         # [B, T]
    return chroma, chroma_mask


if __name__ == "__main__":
    sr = 16000
    n_fft = 128
    hop_length = 32
    B, L = 2, 256

    key = jax.random.PRNGKey(0)
    x = jax.random.normal(key, (B, L), dtype=jnp.float32)
    wav_lengths = jnp.array([200, 256], dtype=jnp.int32)

    chroma, chroma_mask = get_chroma(
        x, wav_lengths, sr=sr, hop_length=hop_length, n_fft=n_fft)
    jax.block_until_ready((chroma, chroma_mask))

    T = L // hop_length + 1
    assert chroma.shape == (B, 12, T)
    assert chroma_mask.shape == (B, T)
    assert chroma_mask.dtype == jnp.int32
    print("KERNEL_OK")
</pallas_src>

<mosaic_0001>
module attributes {stable_mosaic.version = 11 : i64} {
  func.func @_chroma_kernel(%arg0: i32, %arg1: i32, %arg2: memref<1x12x32xf32, #tpu.memory_space<vmem>>, %arg3: memref<128x256xbf16, #tpu.memory_space<vmem>>, %arg4: memref<128x128xbf16, #tpu.memory_space<vmem>>, %arg5: memref<1x9x128xf32, #tpu.memory_space<vmem>>, %arg6: memref<9x128xf32, #tpu.memory_space<vmem>>) attributes {dimension_semantics = [#tpu.dimension_semantics<parallel>, #tpu.dimension_semantics<parallel>], iteration_bounds = array<i64: 2, 1>, scalar_prefetch = 0 : i64, scratch_operands = 1 : i64, tpu.core_type = #tpu.core_type<tc>, window_params = [{transform_indices = @transform_0, window_bounds = array<i64: 1, 12, 32>}, {pipeline_mode = #tpu.pipeline_mode<synchronous>, transform_indices = @transform_1, window_bounds = array<i64: 128, 256>}, {pipeline_mode = #tpu.pipeline_mode<synchronous>, transform_indices = @transform_2, window_bounds = array<i64: 128, 128>}, {transform_indices = @transform_3, window_bounds = array<i64: 1, 9, 128>}]} {
    %c9_i32 = arith.constant 9 : i32
    %0 = arith.muli %arg1, %c9_i32 : i32
    %c0_i32 = arith.constant 0 : i32
    %1 = arith.addi %0, %c0_i32 : i32
    %c0 = arith.constant 0 : index
    %2 = arith.index_cast %1 : i32 to index
    %c0_0 = arith.constant 0 : index
    %3 = vector.load %arg2[%c0, %2, %c0_0] : memref<1x12x32xf32, #tpu.memory_space<vmem>>, vector<1x9x32xf32>
    %4 = vector.shape_cast %3 : vector<1x9x32xf32> to vector<9x32xf32>
    %c0_1 = arith.constant 0 : index
    %c0_2 = arith.constant 0 : index
    %5 = vector.load %arg6[%c0_1, %c0_2] : memref<9x128xf32, #tpu.memory_space<vmem>>, vector<9x32xf32>
    tpu.vector_store %arg6[%c0_1, %c0_2], %4 {strides = array<i32>} : memref<9x128xf32, #tpu.memory_space<vmem>>, vector<9x32xf32>,
    %c1_i32 = arith.constant 1 : i32
    %6 = arith.addi %0, %c1_i32 : i32
    %c0_3 = arith.constant 0 : index
    %7 = arith.index_cast %6 : i32 to index
    %c0_4 = arith.constant 0 : index
    %8 = vector.load %arg2[%c0_3, %7, %c0_4] : memref<1x12x32xf32, #tpu.memory_space<vmem>>, vector<1x9x32xf32>
    %9 = vector.shape_cast %8 : vector<1x9x32xf32> to vector<9x32xf32>
    %c0_5 = arith.constant 0 : index
    %c32 = arith.constant 32 : index
    %10 = vector.load %arg6[%c0_5, %c32] : memref<9x128xf32, #tpu.memory_space<vmem>>, vector<9x32xf32>
    tpu.vector_store %arg6[%c0_5, %c32], %9 {strides = array<i32>} : memref<9x128xf32, #tpu.memory_space<vmem>>, vector<9x32xf32>,
    %c2_i32 = arith.constant 2 : i32
    %11 = arith.addi %0, %c2_i32 : i32
    %c0_6 = arith.constant 0 : index
    %12 = arith.index_cast %11 : i32 to index
    %c0_7 = arith.constant 0 : index
    %13 = vector.load %arg2[%c0_6, %12, %c0_7] : memref<1x12x32xf32, #tpu.memory_space<vmem>>, vector<1x9x32xf32>
    %14 = vector.shape_cast %13 : vector<1x9x32xf32> to vector<9x32xf32>
    %c0_8 = arith.constant 0 : index
    %c64 = arith.constant 64 : index
    %15 = vector.load %arg6[%c0_8, %c64] : memref<9x128xf32, #tpu.memory_space<vmem>>, vector<9x32xf32>
    tpu.vector_store %arg6[%c0_8, %c64], %14 {strides = array<i32>} : memref<9x128xf32, #tpu.memory_space<vmem>>, vector<9x32xf32>,
    %c3_i32 = arith.constant 3 : i32
    %16 = arith.addi %0, %c3_i32 : i32
    %c0_9 = arith.constant 0 : index
    %17 = arith.index_cast %16 : i32 to index
    %c0_10 = arith.constant 0 : index
    %18 = vector.load %arg2[%c0_9, %17, %c0_10] : memref<1x12x32xf32, #tpu.memory_space<vmem>>, vector<1x9x32xf32>
    %19 = vector.shape_cast %18 : vector<1x9x32xf32> to vector<9x32xf32>
    %c0_11 = arith.constant 0 : index
    %c96 = arith.constant 96 : index
    %20 = vector.load %arg6[%c0_11, %c96] : memref<9x128xf32, #tpu.memory_space<vmem>>, vector<9x32xf32>
    tpu.vector_store %arg6[%c0_11, %c96], %19 {strides = array<i32>} : memref<9x128xf32, #tpu.memory_space<vmem>>, vector<9x32xf32>,
    %c0_12 = arith.constant 0 : index
    %c0_13 = arith.constant 0 : index
    %21 = vector.load %arg6[%c0_12, %c0_13] : memref<9x128xf32, #tpu.memory_space<vmem>>, vector<9x128xf32>
    %22 = arith.truncf %21 : vector<9x128xf32> to vector<9x128xbf16>
    %c0_14 = arith.constant 0 : index
    %c0_15 = arith.constant 0 : index
    %23 = vector.load %arg3[%c0_14, %c0_15] : memref<128x256xbf16, #tpu.memory_space<vmem>>, vector<128x256xbf16>
    %cst = arith.constant dense<0.000000e+00> : vector<9x256xf32>
    %24 = tpu.matmul %22, %23, %cst {dimension_numbers = #tpu.dot_dimension_numbers<[1], [0], [0], [1], [0, 0, 1, 1], [], []>} : vector<9x128xbf16>, vector<128x256xbf16>, vector<9x256xf32> -> vector<9x256xf32>
    %25 = vector.extract_strided_slice %24 {offsets = [0, 0], sizes = [9, 128], strides = [1, 1]} : vector<9x256xf32> to vector<9x128xf32>
    %26 = vector.extract_strided_slice %24 {offsets = [0, 128], sizes = [9, 128], strides = [1, 1]} : vector<9x256xf32> to vector<9x128xf32>
    %27 = arith.mulf %25, %25 : vector<9x128xf32>
    %28 = arith.mulf %26, %26 : vector<9x128xf32>
    %29 = arith.addf %27, %28 : vector<9x128xf32>
    %30 = math.sqrt %29 : vector<9x128xf32>
    %31 = arith.truncf %30 : vector<9x128xf32> to vector<9x128xbf16>
    %c0_16 = arith.constant 0 : index
    %c0_17 = arith.constant 0 : index
    %32 = vector.load %arg4[%c0_16, %c0_17] : memref<128x128xbf16, #tpu.memory_space<vmem>>, vector<128x128xbf16>
    %cst_18 = arith.constant dense<0.000000e+00> : vector<9x128xf32>
    %33 = tpu.matmul %31, %32, %cst_18 {dimension_numbers = #tpu.dot_dimension_numbers<[1], [0], [0], [1], [0, 0, 1, 1], [], []>} : vector<9x128xbf16>, vector<128x128xbf16>, vector<9x128xf32> -> vector<9x128xf32>
    %c0_19 = arith.constant 0 : index
    %c0_20 = arith.constant 0 : index
    %c0_21 = arith.constant 0 : index
    %34 = vector.load %arg5[%c0_19, %c0_20, %c0_21] : memref<1x9x128xf32, #tpu.memory_space<vmem>>, vector<1x9x128xf32>
    %35 = vector.shape_cast %34 : vector<1x9x128xf32> to vector<9x128xf32>
    %36 = vector.shape_cast %33 : vector<9x128xf32> to vector<1x9x128xf32>
    tpu.vector_store %arg5[%c0_19, %c0_20, %c0_21], %36 {strides = array<i32>} : memref<1x9x128xf32, #tpu.memory_space<vmem>>, vector<1x9x128xf32>,
    return
  }
  func.func @transform_0(%arg0: i32, %arg1: i32) -> (i32, i32, i32) {
    %c0_i32 = arith.constant 0 : i32
    %c0_i32_0 = arith.constant 0 : i32
    %c0_i32_1 = arith.constant 0 : i32
    return %arg0, %c0_i32, %c0_i32_0 : i32, i32, i32
  }
  func.func @transform_1(%arg0: i32, %arg1: i32) -> (i32, i32) {
    %c0_i32 = arith.constant 0 : i32
    %c0_i32_0 = arith.constant 0 : i32
    %c0_i32_1 = arith.constant 0 : i32
    return %c0_i32, %c0_i32_0 : i32, i32
  }
  func.func @transform_2(%arg0: i32, %arg1: i32) -> (i32, i32) {
    %c0_i32 = arith.constant 0 : i32
    %c0_i32_0 = arith.constant 0 : i32
    %c0_i32_1 = arith.constant 0 : i32
    return %c0_i32, %c0_i32_0 : i32, i32
  }
  func.func @transform_3(%arg0: i32, %arg1: i32) -> (i32, i32, i32) {
    %c0_i32 = arith.constant 0 : i32
    %c0_i32_0 = arith.constant 0 : i32
    return %arg0, %arg1, %c0_i32 : i32, i32, i32
  }
}

</mosaic_0001>

<bundles_post_ra>
// kernel: tpu_custom_call.1
= control target key start
LH: loop header
LB: loop body
LE: loop exit
PB: predicated region body
PF: predicated region fallthrough
CT: control target
= control target key end

     0   :  { %8 = vsyncpa [#allocation4], 0  ;;  %s1039_s0 = inlined_call_operand.vmem [shape: f32[2,12,32], index: 0, kind: input, shape index: {}]   ;;  %s1040_s1 = inlined_call_operand.hbm [shape: bf16[128,256], index: 1, kind: input, shape index: {}]   ;;  %s1041_s2 = inlined_call_operand.hbm [shape: bf16[128,128], index: 2, kind: input, shape index: {}]   ;;  %s1042_s3 = inlined_call_operand.vmem [shape: f32[2,9,128], index: 3, kind: output, shape index: {}]  }
   0x1   :  { %9 = vsyncpa [#allocation6], 0  ;;  %s956_s12 = smov 0   ;;  %s958_s13 = smov 0  }
   0x2   :  { %s960_s14 = smov 0  }
   0x3 LB: > { %s636_s15 = sadd.s32 4294967295, %s925_s14   ;;  %s27_s16 = sadd.s32 1, %s921_s13  ;;  %s925_s14 = sphi %s960_s14, %s15_s14   ;;  %s921_s13 = sphi %s958_s13, %s1046_s13   ;;  %s917_s12 = sphi %s956_s12, %s1045_s12  }
   0x4   : > { %p29_p0 = scmp.ge.s32.totalorder %s27_s16, 2  ;;  %p638_p1 = scmp.ge.s32.totalorder %s925_s14, 1 }
   0x5   : > { %p128_p2 = scmp.lt.s32.totalorder %s925_s14, 3  ;;  %p981_p4 = scmp.eq.s32.totalorder %s636_s15, 0 }
   0x6   : > { %s1048_s16 = smov (%p29_p0, %s27_s16), 0  ;;  %s139_s21 = sshll.u32 %s1040_s1, 4  ;;  %s140_s21 = int_to_ptr.hbm [resolvable:$true] %s139_s21 }
   0x7   : > { %p977_p3 = pnand %p638_p1, %p128_p2  ;;  %s927_s22 = smov [#allocation3]  }
   0x8   : > { %s141_s23 = sshll.u32 %s927_s22, 4  ;;  %s153_s26 = sshll.u32 %s1041_s2, 4  ;;  %s142_s23 = int_to_ptr.vmem [resolvable:$true] %s141_s23  ;;  %s154_s26 = int_to_ptr.hbm [resolvable:$true] %s153_s26 }
   0x9   : > { %p787_p5 = pneg %p977_p3  ;;  %s928_s27 = smov 128  }
   0xa   : > { %s929_s28 = smov 8   ;;  %s930_s29 = smov [#allocation5]  }
   0xb   : > { %p788_p6 = pnand %p981_p4, %p787_p5  ;;  %s155_s30 = sshll.u32 %s930_s29, 4  ;;  %s156_s30 = int_to_ptr.vmem [resolvable:$true] %s155_s30 }
   0xc   : > { %s931_s4 = smov 64   ;;  %s932_s5 = smov 4  }
   0xd   : > { %790 = dma.hbm_to_vmem [thread:$0]  (!%p788_p6), %s140_s21, 2048, %s142_s23, [#allocation4], %s928_s27, %s928_s27, %s929_s28  }
   0xe   : > { %793 = dma.hbm_to_vmem [thread:$0]  (!%p788_p6), %s154_s26, 1024, %s156_s30, [#allocation6], %s931_s4, %s931_s4, %s932_s5  }
   0xf   : > { %179 = sbr.rel (%p977_p3) target bundleno = 466 (0x1d2), region = 32 }
  0x14   : > { %908 = dma.done.wait (%p981_p4), [#allocation4], 2048  }
  0x15   : > { %910 = vsyncadd (%p981_p4), [#allocation4], 4294965248 }
  0x16   : > { %912 = dma.done.wait (%p981_p4), [#allocation6], 1024  }
  0x17   : > { %914 = vsyncadd (%p981_p4), [#allocation6], 4294966272  ;;  %p213_p7 = scmp.lt.s32.totalorder %s917_s12, 1  ;;  %s933_s10 = smov 32   ;;  %v713_v3 = vld [vmem:[#allocation3 + $0x70] sm:$0xf] }
  0x18   : > { %s934_s11 = smov 64   ;;  %s935_s15 = smov 96   ;;  %v770_v4 = vld [vmem:[#allocation3 + $0x74] sm:$0xf0]  ;;  %v769_v5 = vld [vmem:[#allocation3 + $0x74] sm:$0xf] }
  0x19   : > { %s1050_s12 = smov (!%p213_p7, %s917_s12), 1  ;;  %v714_v6 = vor.u32 %v770_v4, %v713_v3  ;;  %v715_v7 = vld [vmem:[#allocation3 + $0x78] sm:$0xf0]  ;;  %v705_v8 = vld [vmem:[#allocation3 + $0x60] sm:$0xf]  ;;  %vm232_vm0 = vcmask 261120  }
  0x1a   : > { %s753_s6 = sshll.u32 %s1050_s12, 4  ;;  %v768_v9 = vld [vmem:[#allocation3 + $0x64] sm:$0xf0]  ;;  %v718_v10 = vor.u32 %v769_v5, %v715_v7  ;;  %v767_v11 = vld [vmem:[#allocation3 + $0x64] sm:$0xf]  ;;  %vm234_vm1 = vcmask 253952  }
  0x1b   : > { %s1015_s9 = scalar_lea.vmem %s1039_s0, %s753_s6  ;;  %v707_v12 = vld [vmem:[#allocation3 + $0x68] sm:$0xf0]  ;;  %383 = vmatpush.bf16.msra.mxu0 %v714_v6  ;;  %v706_v15 = vor.u32 %v768_v9, %v705_v8  ;;  %v697_v18 = vld [vmem:[#allocation3 + $0x50] sm:$0xf]  ;;  %v766_v19 = vld [vmem:[#allocation3 + $0x54] sm:$0xf0]  ;;  %s226_s19 = scalar_lea.vmem %s1042_s3, %s753_s6 }
  0x1c   : > { %v649_v0 = vld [vmem:[%s1015_s9 + $0x1] sm:$0xff]  ;;  %v650_v13 = vld [vmem:[%s1015_s9 + $0x9] sm:$0x1]  ;;  %v652_v14 = vld [vmem:[%s1015_s9 + $0xa] sm:$0x1]  ;;  %397 = vmatpush.bf16.msra.mxu1 %v718_v10  ;;  %v710_v17 = vor.u32 %v767_v11, %v707_v12  ;;  %v698_v22 = vor.u32 %v766_v19, %v697_v18  ;;  %vm248_vm2 = vcmask 523520  }
  0x1d   : > { %v651_v1 = vld [vmem:[%s1015_s9 + $0x2] sm:$0xff]  ;;  %242 = vrot.lane.b32.xlu0 %v649_v0, %s933_s10  ;;  %v654_v16 = vld [vmem:[%s1015_s9 + $0xb] sm:$0x1]  ;;  %v699_v21 = vld [vmem:[#allocation3 + $0x58] sm:$0xf0]  ;;  %vm264_vm3 = vcmask 785920  }
  0x1e   : > { %258 = vrot.lane.b32.xlu1 %v651_v1, %s934_s11  ;;  %v653_v2 = vld [vmem:[%s1015_s9 + $0x3] sm:$0xff]  ;;  %v689_v25 = vld [vmem:[#allocation3 + $0x40] sm:$0xf]  ;;  %v764_v26 = vld [vmem:[#allocation3 + $0x44] sm:$0xf0]  ;;  %vm280_vm4 = vcmask 1048320  }
  0x1f   : > { %274 = vrot.lane.b32.xlu2 %v653_v2, %s935_s15  ;;  %v765_v20 = vld [vmem:[#allocation3 + $0x54] sm:$0xf]  ;;  %384 = vmatpush.bf16.msra.mxu0 %v706_v15  ;;  %v690_v27 = vor.u32 %v764_v26, %v689_v25  ;;  %v763_v28 = vld [vmem:[#allocation3 + $0x44] sm:$0xf]  ;;  %v691_v29 = vld [vmem:[#allocation3 + $0x48] sm:$0xf0] }
  0x20   : > { %398 = vmatpush.bf16.msra.mxu1 %v710_v17  ;;  %v702_v23 = vor.u32 %v765_v20, %v699_v21  ;;  %v230_v24 = vld [vmem:[%s1015_s9] sm:$0xff]  ;;  %v694_v30 = vor.u32 %v763_v28, %v691_v29  ;;  %v762_v32 = vld [vmem:[#allocation3 + $0x34] sm:$0xf0]  ;;  %v683_v35 = vld [vmem:[#allocation3 + $0x38] sm:$0xf0]  ;;  %vm250_vm5 = vcmask 516352  }
  0x21   : > { %233 = vst.msk [vmem:[#allocation2] sm:$0xff] %vm232_vm0, %v230_v24  ;;  %v681_v31 = vld [vmem:[#allocation3 + $0x30] sm:$0xf]  ;;  %v761_v33 = vld [vmem:[#allocation3 + $0x34] sm:$0xf]  ;;  %vm266_vm6 = vcmask 778752  }
  0x22   : > { %v682_v34 = vor.u32 %v762_v32, %v681_v31  ;;  %v686_v36 = vor.u32 %v761_v33, %v683_v35  ;;  %v231_v37 = vld [vmem:[%s1015_s9 + $0x8] sm:$0x1]  ;;  %v673_v38 = vld [vmem:[#allocation3 + $0x20] sm:$0xf]  ;;  %v760_v39 = vld [vmem:[#allocation3 + $0x24] sm:$0xf0] }
  0x23   : > { %385 = vmatpush.bf16.msra.mxu0 %v698_v22  ;;  %235 = vst.msk [vmem:[#allocation2 + $0x8] sm:$0x1] %vm234_vm1, %v231_v37  ;;  %v674_v40 = vor.u32 %v760_v39, %v673_v38  ;;  %v759_v41 = vld [vmem:[#allocation3 + $0x24] sm:$0xf]  ;;  %v675_v42 = vld [vmem:[#allocation3 + $0x28] sm:$0xf0] }
  0x24   : > { %399 = vmatpush.bf16.msra.mxu1 %v702_v23  ;;  %v678_v43 = vor.u32 %v759_v41, %v675_v42  ;;  %v665_v44 = vld [vmem:[#allocation3 + $0x10] sm:$0xf]  ;;  %v758_v45 = vld [vmem:[#allocation3 + $0x14] sm:$0xf0]  ;;  %v757_v46 = vld [vmem:[#allocation3 + $0x14] sm:$0xf] }
  0x25   : > { %244 = vrot.lane.b32.xlu0 %v650_v13, %s933_s10  ;;  %v666_v47 = vor.u32 %v758_v45, %v665_v44  ;;  %v667_v48 = vld [vmem:[#allocation3 + $0x18] sm:$0xf0]  ;;  %v657_v49 = vld [vmem:[#allocation3] sm:$0xf]  ;;  %v756_v50 = vld [vmem:[#allocation3 + $0x4] sm:$0xf0] }
  0x26   : > { %260 = vrot.lane.b32.xlu1 %v652_v14, %s934_s11  ;;  %v670_v51 = vor.u32 %v757_v46, %v667_v48  ;;  %v755_v52 = vld [vmem:[#allocation3 + $0x4] sm:$0xf]  ;;  %v659_v53 = vld [vmem:[#allocation3 + $0x8] sm:$0xf0]  ;;  %v658_v54 = vor.u32 %v756_v50, %v657_v49  ;;  %vm282_vm7 = vcmask 1041152   ;;  %v778_v1 = vld [vmem:[#allocation5 + $0x38] sm:$0xff] }
  0x27   : > { %276 = vrot.lane.b32.xlu2 %v654_v16, %s935_s15  ;;  %386 = vmatpush.bf16.msra.mxu0 %v690_v27  ;;  %v662_v55 = vor.u32 %v755_v52, %v659_v53  ;;  %v777_v2 = vld [vmem:[#allocation5 + $0x30] sm:$0xff]  ;;  %v776_v3 = vld [vmem:[#allocation5 + $0x28] sm:$0xff]  ;;  %v775_v4 = vld [vmem:[#allocation5 + $0x20] sm:$0xff] }
  0x28   : > { %400 = vmatpush.bf16.msra.mxu1 %v694_v30  ;;  %506 = vmatpush.bf16.msra.mxu2 %v778_v1  ;;  %v774_v5 = vld [vmem:[#allocation5 + $0x18] sm:$0xff]  ;;  %v773_v6 = vld [vmem:[#allocation5 + $0x10] sm:$0xff]  ;;  %v772_v7 = vld [vmem:[#allocation5 + $0x8] sm:$0xff] }
  0x29   : > { %v771_v8 = vld [vmem:[#allocation5] sm:$0xff] }
  0x2b   : > { %387 = vmatpush.bf16.msra.mxu0 %v682_v34 }
  0x2c   : > { %401 = vmatpush.bf16.msra.mxu1 %v686_v36  ;;  %507 = vmatpush.bf16.msra.mxu2 %v777_v2 }
  0x2f   : > { %388 = vmatpush.bf16.msra.mxu0 %v674_v40 }
  0x30   : > { %402 = vmatpush.bf16.msra.mxu1 %v678_v43  ;;  %508 = vmatpush.bf16.msra.mxu2 %v776_v3 }
  0x33   : > { %389 = vmatpush.bf16.msra.mxu0 %v666_v47 }
  0x34   : > { %403 = vmatpush.bf16.msra.mxu1 %v670_v51  ;;  %509 = vmatpush.bf16.msra.mxu2 %v775_v4 }
  0x37   : > { %390 = vmatpush.bf16.msra.mxu0 %v658_v54 }
  0x38   : > { %404 = vmatpush.bf16.msra.mxu1 %v662_v55  ;;  %510 = vmatpush.bf16.msra.mxu2 %v774_v5 }
  0x3c   : > { %511 = vmatpush.bf16.msra.mxu2 %v773_v6 }
  0x40   : > { %512 = vmatpush.bf16.msra.mxu2 %v772_v7 }
  0x44   : > { %513 = vmatpush.bf16.msra.mxu2 %v771_v8 }
  0x79   : > { %v275_v56 = vpop.permute.xlu2 %274 }
  0x81   : > { %v277_v59 = vpop.permute.xlu2 %276 }
  0x8f   : > { %v243_v57 = vpop.permute.xlu0 %242 }
  0x90   : > { %v259_v58 = vpop.permute.xlu1 %258  ;;  %249 = vst.msk [vmem:[#allocation2] sm:$0xff] %vm248_vm2, %v243_v57 }
  0x91   : > { %265 = vst.msk [vmem:[#allocation2] sm:$0xff] %vm264_vm3, %v259_v58 }
  0x92   : > { %281 = vst.msk [vmem:[#allocation2] sm:$0xff] %vm280_vm4, %v275_v56 }
  0x97   : > { %v245_v60 = vpop.permute.xlu0 %244 }
  0x98   : > { %v261_v61 = vpop.permute.xlu1 %260  ;;  %251 = vst.msk [vmem:[#allocation2 + $0x8] sm:$0x1] %vm250_vm5, %v245_v60 }
  0x99   : > { %267 = vst.msk [vmem:[#allocation2 + $0x8] sm:$0x1] %vm266_vm6, %v261_v61  ;;  %v284_v62 = vld [vmem:[#allocation2] sm:$0xff] }
  0x9a   : > { %283 = vst.msk [vmem:[#allocation2 + $0x8] sm:$0x1] %vm282_vm7, %v277_v59 }
  0xa1   : > { %v285_v63 = vld [vmem:[#allocation2 + $0x8] sm:$0x1] }
  0xa2   : > { %v286_v0 = vpack.c.bf16 %v285_v63, %v284_v62 }
  0xa4   : > { %391 = vmatmul.bf16.vlgmr.msra.gmra.mxu0 %v286_v0  ;;  %405 = vmatmul.bf16.vlgmr.msra.gmra.mxu1 %v286_v0 }
 0x121   : > { %v392_v9 = vpop.f32.mrf.mxu0  ;;  %v406_v10 = vpop.f32.mrf.mxu1 }
 0x122   : > { %v411_v11 = vmul.f32 %v392_v9, %v392_v9  ;;  %v413_v12 = vmul.f32 %v406_v10, %v406_v10 }
 0x124   : > { %v415_v13 = vadd.f32 %v413_v12, %v411_v11 }
 0x126   : > { %831 = vrsqrt.f32 %v415_v13  ;;  %vm424_vm8 = vcmp.eq.f32.partialorder %v415_v13, inf  ;;  %v427_v34 = vand.u32 2147483648, %v415_v13  ;;  %vm426_vm10 = vcmp.eq.f32.partialorder %v415_v13, 0.0 }
 0x129   : > { %v394_v14 = vpop.f32.mrf.mxu0  ;;  %v408_v15 = vpop.f32.mrf.mxu1 }
 0x12a   : > { %v412_v16 = vmul.f32 %v394_v14, %v394_v14  ;;  %v414_v17 = vmul.f32 %v408_v15, %v408_v15 }
 0x12c   : > { %v832_v18 = vpop.eup %831  ;;  %v416_v19 = vadd.f32 %v414_v17, %v412_v16 }
 0x12d   : > { %v418_v20 = vmul.f32 %v832_v18, %v415_v13 }
 0x12e   : > { %833 = vrsqrt.f32 %v416_v19  ;;  %vm436_vm9 = vcmp.eq.f32.partialorder %v416_v19, inf  ;;  %v439_v35 = vand.u32 2147483648, %v416_v19  ;;  %vm438_vm11 = vcmp.eq.f32.partialorder %v416_v19, 0.0 }
 0x12f   : > { %v419_v21 = vmul.f32 %v832_v18, %v418_v20 }
 0x131   : > { %v420_v22 = vmul.f32 0.5, %v419_v21 }
 0x133   : > { %v421_v23 = vsub.f32 1.5, %v420_v22 }
 0x134   : > { %v834_v24 = vpop.eup %833 }
 0x135   : > { %v430_v25 = vmul.f32 %v834_v24, %v416_v19  ;;  %v422_v26 = vmul.f32 %v832_v18, %v421_v23 }
 0x137   : > { %v431_v27 = vmul.f32 %v834_v24, %v430_v25  ;;  %v423_v29 = vmul.f32 %v422_v26, %v415_v13 }
 0x139   : > { %v432_v28 = vmul.f32 0.5, %v431_v27  ;;  %v425_v32 = vsel %vm424_vm8, %v415_v13, %v423_v29 }
 0x13a   : > { %v428_v37 = vsel %vm426_vm10, %v427_v34, %v425_v32 }
 0x13b   : > { %v433_v30 = vsub.f32 1.5, %v432_v28 }
 0x13d   : > { %v434_v31 = vmul.f32 %v834_v24, %v433_v30 }
 0x13f   : > { %v435_v33 = vmul.f32 %v434_v31, %v416_v19 }
 0x141   : > { %v437_v36 = vsel %vm436_vm9, %v416_v19, %v435_v33 }
 0x142   : > { %v440_v38 = vsel %vm438_vm11, %v439_v35, %v437_v36 }
 0x143   : > { %v441_v39 = vpack.c.bf16 %v440_v38, %v428_v37 }
 0x145   : > { %514 = vmatmul.bf16.vlgmr.msra.gmra.mxu2 %v441_v39 }
 0x1c8   : > { %v515_v40 = vpop.f32.mrf.mxu2 }
 0x1c9   : > { %520 = vst [vmem:[%s226_s19] sm:$0xff] %v515_v40 }
 0x1d0   : > { %v517_v41 = vpop.f32.mrf.mxu2 }
 0x1d1   : > { %521 = vst [vmem:[%s226_s19 + $0x8] sm:$0x1] %v517_v41 }
 0x1d2 PF: > { %s15_s14 = sadd.s32 1, %s925_s14   ;;  %s1045_s12 = smov %s921_s13 }
 0x1d3   : > { %p12_p8 = scmp.ge.s32.totalorder %s15_s14, 4   ;;  %s1046_s13 = smov %s1048_s16 }
 0x1d5   :  { %14 = sbr.rel (!%p12_p8) target bundleno = 3 (0x3), region = 75 }
 0x1da   :  { %552 = vsyncpa [#allocation4], 1 }
 0x1db   :  { %554 = vsyncpa [#allocation4 + $0x1], 1 }
 0x1dc   :  { %555 = vsyncpa [#allocation6], 1 }

</bundles_post_ra>
